<compile_context>
chip_gen: v6e
topology: v6e:2x2x1
jax: 0.10.0
libtpu: 0.0.40
codegen_flags: <defaults>
</compile_context>

<pallas_src>
import math
import numpy as np
import jax
import jax.numpy as jnp
from jax.experimental import pallas as pl
from jax.experimental.pallas import tpu as pltpu

_BN_EPS = 1e-5


def _mish(v):
    # Mish(x) = x * tanh(softplus(x)); exp/log/tanh all map to the EUP.
    return v * jnp.tanh(jnp.log(1.0 + jnp.exp(v)))


def _make_csp_kernel(H, W, hid, n, shortcut):
    HW = H * W
    P = W + 1  # halo needed on the flattened axis for a 3x3 'same' conv

    def kernel(x_ref, w1_ref, b1_ref, wb1_ref, bb1_ref, wb2_ref, bb2_ref,
               w3_ref, w2_ref, bns_ref, bnb_ref, w4_ref, b4_ref, em_ref,
               o_ref, pad_ref):
        # x_ref:   (1, Cin, HW)  one batch element, channels-first, flattened HW
        # w*_ref:  folded 2-D weights (Cout, Cin) / (Cout, 9*Cin); b*_ref: (Cout, 1)
        # em_ref:  (2, HW) column-edge masks (row 0: w>0 valid, row 1: w<W-1 valid)
        # o_ref:   (1, Cout, HW)
        # pad_ref: (hid, HW + 2*P) VMEM scratch, zero halo for the 3x3 taps
        pad_ref[...] = jnp.zeros_like(pad_ref)
        mask_l = em_ref[0:1, :]   # used when reading column w-1
        mask_r = em_ref[1:2, :]   # used when reading column w+1

        x = x_ref[0]                                                # (Cin, HW)

        # conv1 (1x1) + BN + Mish
        a = _mish(jnp.dot(w1_ref[...], x,
                          preferred_element_type=jnp.float32) + b1_ref[...])

        # Bottleneck sequence (internal expansion = 1.0)
        t = a
        for i in range(n):
            u = _mish(jnp.dot(wb1_ref[i], t,
                              preferred_element_type=jnp.float32) + bb1_ref[i])
            # 3x3 'same' conv as a single im2col matmul.
            pad_ref[:, P:P + HW] = u
            taps = []
            for dh in (-1, 0, 1):
                for dw in (-1, 0, 1):
                    d = dh * W + dw
                    tap = pad_ref[:, P + d:P + d + HW]              # (hid, HW)
                    if dw == -1:
                        tap = tap * mask_l
                    elif dw == 1:
                        tap = tap * mask_r
                    taps.append(tap)
            patches = jnp.concatenate(taps, axis=0)                 # (9*hid, HW)
            v = _mish(jnp.dot(wb2_ref[i], patches,
                              preferred_element_type=jnp.float32) + bb2_ref[i])
            t = t + v if shortcut else v

        # y1 = conv3(seq(conv1(x))), y2 = conv2(x)  (plain 1x1, no bias/BN/act)
        y1 = jnp.dot(w3_ref[...], t, preferred_element_type=jnp.float32)
        y2 = jnp.dot(w2_ref[...], x, preferred_element_type=jnp.float32)
        cat = jnp.concatenate([y1, y2], axis=0)                     # (2*hid, HW)

        # BN + Mish on the concat, then conv4 (1x1) + BN + Mish
        z = _mish(cat * bns_ref[...] + bnb_ref[...])
        out = _mish(jnp.dot(w4_ref[...], z,
                            preferred_element_type=jnp.float32) + b4_ref[...])
        o_ref[0] = out.astype(o_ref.dtype)

    return kernel


def _conv_weight(key, cout, cin, k):
    bound = 1.0 / math.sqrt(cin * k * k)       # PyTorch Conv2d default init range
    return jax.random.uniform(key, (cout, cin, k, k), minval=-bound, maxval=bound,
                              dtype=jnp.float32)


def _bn_stats(key, c):
    k1, k2, k3, k4 = jax.random.split(key, 4)
    gamma = jax.random.uniform(k1, (c,), minval=0.5, maxval=1.5, dtype=jnp.float32)
    beta = 0.1 * jax.random.normal(k2, (c,), dtype=jnp.float32)
    mean = 0.1 * jax.random.normal(k3, (c,), dtype=jnp.float32)
    var = jax.random.uniform(k4, (c,), minval=0.5, maxval=1.5, dtype=jnp.float32)
    return gamma, beta, mean, var


def _fold_bn(w_oihw, gamma, beta, mean, var):
    scale = gamma / jnp.sqrt(var + _BN_EPS)
    return w_oihw * scale[:, None, None, None], beta - mean * scale


class BottleneckCSPPallas:
    """JAX/Pallas port of BottleneckCSP (eval-mode BN folded into conv weights)."""

    def __init__(self, in_ch, out_ch, n=1, shortcut=True, groups=1, expansion=0.5,
                 key=None):
        # TODO(synk): grouped convolutions (groups > 1) not implemented; only the
        # module default groups=1 is supported.
        assert groups == 1
        self.in_ch, self.out_ch, self.n, self.shortcut = in_ch, out_ch, n, shortcut
        hid = int(out_ch * expansion)
        self.hid = hid
        key = jax.random.PRNGKey(0) if key is None else key
        ks = list(jax.random.split(key, 8 + 4 * n))

        # conv1: Conv(in_ch, hid, 1) = conv(no bias) + BN + Mish
        self.w1_oihw, self.b1_vec = _fold_bn(_conv_weight(ks[0], hid, in_ch, 1),
                                             *_bn_stats(ks[1], hid))
        # conv2 / conv3: plain 1x1 Conv2d, bias=False (no BN, no act)
        self.w2_oihw = _conv_weight(ks[2], hid, in_ch, 1)
        self.w3_oihw = _conv_weight(ks[3], hid, hid, 1)
        # conv4: Conv(2*hid, out_ch, 1)
        self.w4_oihw, self.b4_vec = _fold_bn(_conv_weight(ks[4], out_ch, 2 * hid, 1),
                                             *_bn_stats(ks[5], out_ch))
        # bn on the cross-stage concat (2*hid channels)
        gamma, beta, mean, var = _bn_stats(ks[6], 2 * hid)
        scale = gamma / jnp.sqrt(var + _BN_EPS)
        self.bns_vec = scale
        self.bnb_vec = beta - mean * scale
        # Bottleneck sequence (n blocks, each: 1x1 Conv + 3x3 Conv, both BN+Mish)
        wb1, bb1, wb2, bb2 = [], [], [], []
        for i in range(n):
            ka, kb, kc, kd = ks[7 + 4 * i: 11 + 4 * i]
            w, b = _fold_bn(_conv_weight(ka, hid, hid, 1), *_bn_stats(kb, hid))
            wb1.append(w); bb1.append(b)
            w, b = _fold_bn(_conv_weight(kc, hid, hid, 3), *_bn_stats(kd, hid))
            wb2.append(w); bb2.append(b)
        self.wb1_oihw = jnp.stack(wb1); self.bb1_vec = jnp.stack(bb1)
        self.wb2_oihw = jnp.stack(wb2); self.bb2_vec = jnp.stack(bb2)

        # --- 2-D lane-dense layouts consumed by the Pallas kernel ---
        self.w1_2d = self.w1_oihw[:, :, 0, 0]                       # (hid, in_ch)
        self.w2_2d = self.w2_oihw[:, :, 0, 0]
        self.w3_2d = self.w3_oihw[:, :, 0, 0]
        self.w4_2d = self.w4_oihw[:, :, 0, 0]                       # (out, 2*hid)
        self.b1_2d = self.b1_vec.reshape(hid, 1)
        self.b4_2d = self.b4_vec.reshape(out_ch, 1)
        self.bns_2d = self.bns_vec.reshape(2 * hid, 1)
        self.bnb_2d = self.bnb_vec.reshape(2 * hid, 1)
        self.wb1_2d = self.wb1_oihw[:, :, :, 0, 0]                  # (n, hid, hid)
        self.bb1_2d = self.bb1_vec.reshape(n, hid, 1)
        # im2col layout: column index = (kh*3 + kw)*hid + ci
        self.wb2_2d = jnp.transpose(self.wb2_oihw, (0, 1, 3, 4, 2)).reshape(
            n, hid, 9 * hid)
        self.bb2_2d = self.bb2_vec.reshape(n, hid, 1)

    def __call__(self, x_nchw):
        N, C, H, W = x_nchw.shape
        assert C == self.in_ch
        HW = H * W
        hid, out_ch, n = self.hid, self.out_ch, self.n
        x_flat = x_nchw.reshape(N, C, HW)        # free reshape, stays NCHW

        # Column-edge masks for the shifted 3x3 taps (static, built host-side).
        w_idx = np.arange(HW) % W
        edge = jnp.asarray(
            np.stack([(w_idx > 0), (w_idx < W - 1)]).astype(np.float32))  # (2, HW)

        kernel = _make_csp_kernel(H, W, hid, n, self.shortcut)
        const2d = lambda b: (0, 0)
        const3d = lambda b: (0, 0, 0)
        out_flat = pl.pallas_call(
            kernel,
            out_shape=jax.ShapeDtypeStruct((N, out_ch, HW), x_nchw.dtype),
            grid=(N,),
            in_specs=[
                pl.BlockSpec((1, C, HW), lambda b: (b, 0, 0)),      # x
                pl.BlockSpec((hid, C), const2d),                    # w1
                pl.BlockSpec((hid, 1), const2d),                    # b1
                pl.BlockSpec((n, hid, hid), const3d),               # bottleneck w1
                pl.BlockSpec((n, hid, 1), const3d),                 # bottleneck b1
                pl.BlockSpec((n, hid, 9 * hid), const3d),           # bottleneck w2
                pl.BlockSpec((n, hid, 1), const3d),                 # bottleneck b2
                pl.BlockSpec((hid, hid), const2d),                  # w3
                pl.BlockSpec((hid, C), const2d),                    # w2 (csp)
                pl.BlockSpec((2 * hid, 1), const2d),                # bn scale
                pl.BlockSpec((2 * hid, 1), const2d),                # bn bias
                pl.BlockSpec((out_ch, 2 * hid), const2d),           # w4
                pl.BlockSpec((out_ch, 1), const2d),                 # b4
                pl.BlockSpec((2, HW), const2d),                     # edge masks
            ],
            out_specs=pl.BlockSpec((1, out_ch, HW), lambda b: (b, 0, 0)),
            scratch_shapes=[pltpu.VMEM((hid, HW + 2 * (W + 1)), jnp.float32)],
            compiler_params=pltpu.CompilerParams(
                dimension_semantics=("parallel",)),
        )(x_flat, self.w1_2d, self.b1_2d, self.wb1_2d, self.bb1_2d,
          self.wb2_2d, self.bb2_2d, self.w3_2d, self.w2_2d,
          self.bns_2d, self.bnb_2d, self.w4_2d, self.b4_2d, edge)
        return out_flat.reshape(N, out_ch, H, W)   # free reshape, already NCHW

    # Pure-JAX (lax.conv) reference using the same folded parameters.
    def reference(self, x):
        def conv(t, w):
            k = w.shape[-1]
            p = (k - 1) // 2
            return jax.lax.conv_general_dilated(
                t, w, (1, 1), [(p, p), (p, p)],
                dimension_numbers=('NCHW', 'OIHW', 'NCHW'))

        def bias(v):
            return v[None, :, None, None]

        a = _mish(conv(x, self.w1_oihw) + bias(self.b1_vec))
        t = a
        for i in range(self.n):
            u = _mish(conv(t, self.wb1_oihw[i]) + bias(self.bb1_vec[i]))
            u = _mish(conv(u, self.wb2_oihw[i]) + bias(self.bb2_vec[i]))
            t = t + u if self.shortcut else u
        y1 = conv(t, self.w3_oihw)
        y2 = conv(x, self.w2_oihw)
        cat = jnp.concatenate([y1, y2], axis=1)
        z = _mish(cat * bias(self.bns_vec) + bias(self.bnb_vec))
        return _mish(conv(z, self.w4_oihw) + bias(self.b4_vec))


if __name__ == "__main__":
    key = jax.random.PRNGKey(0)
    kx, kp = jax.random.split(key)
    x = jax.random.normal(kx, (2, 4, 16, 16), dtype=jnp.float32)    # NCHW

    csp = BottleneckCSPPallas(in_ch=4, out_ch=8, n=1, shortcut=True, key=kp)
    y = csp(x)
    jax.block_until_ready(y)

    y_ref = csp.reference(x)
    assert y.shape == (2, 8, 16, 16), y.shape
    err = float(jnp.max(jnp.abs(y - y_ref)))
    assert jnp.allclose(y, y_ref, atol=1e-3, rtol=1e-3), err
    print("KERNEL_OK")
</pallas_src>

<mosaic_0001>
module attributes {stable_mosaic.version = 11 : i64} {
  func.func @kernel(%arg0: i32, %arg1: memref<1x4x256xf32, #tpu.memory_space<vmem>>, %arg2: memref<4x4xf32, #tpu.memory_space<vmem>>, %arg3: memref<4x1xf32, #tpu.memory_space<vmem>>, %arg4: memref<1x4x4xf32, #tpu.memory_space<vmem>>, %arg5: memref<1x4x1xf32, #tpu.memory_space<vmem>>, %arg6: memref<1x4x36xf32, #tpu.memory_space<vmem>>, %arg7: memref<1x4x1xf32, #tpu.memory_space<vmem>>, %arg8: memref<4x4xf32, #tpu.memory_space<vmem>>, %arg9: memref<4x4xf32, #tpu.memory_space<vmem>>, %arg10: memref<8x1xf32, #tpu.memory_space<vmem>>, %arg11: memref<8x1xf32, #tpu.memory_space<vmem>>, %arg12: memref<8x8xf32, #tpu.memory_space<vmem>>, %arg13: memref<8x1xf32, #tpu.memory_space<vmem>>, %arg14: memref<2x256xf32, #tpu.memory_space<vmem>>, %arg15: memref<1x8x256xf32, #tpu.memory_space<vmem>>, %arg16: memref<4x290xf32, #tpu.memory_space<vmem>>) attributes {dimension_semantics = [#tpu.dimension_semantics<parallel>], iteration_bounds = array<i64: 2>, scalar_prefetch = 0 : i64, scratch_operands = 1 : i64, tpu.core_type = #tpu.core_type<tc>, window_params = [{transform_indices = @transform_0, window_bounds = array<i64: 1, 4, 256>}, {pipeline_mode = #tpu.pipeline_mode<synchronous>, transform_indices = @transform_1, window_bounds = array<i64: 4, 4>}, {pipeline_mode = #tpu.pipeline_mode<synchronous>, transform_indices = @transform_2, window_bounds = array<i64: 4, 1>}, {pipeline_mode = #tpu.pipeline_mode<synchronous>, transform_indices = @transform_3, window_bounds = array<i64: 1, 4, 4>}, {pipeline_mode = #tpu.pipeline_mode<synchronous>, transform_indices = @transform_4, window_bounds = array<i64: 1, 4, 1>}, {pipeline_mode = #tpu.pipeline_mode<synchronous>, transform_indices = @transform_5, window_bounds = array<i64: 1, 4, 36>}, {pipeline_mode = #tpu.pipeline_mode<synchronous>, transform_indices = @transform_6, window_bounds = array<i64: 1, 4, 1>}, {pipeline_mode = #tpu.pipeline_mode<synchronous>, transform_indices = @transform_7, window_bounds = array<i64: 4, 4>}, {pipeline_mode = #tpu.pipeline_mode<synchronous>, transform_indices = @transform_8, window_bounds = array<i64: 4, 4>}, {pipeline_mode = #tpu.pipeline_mode<synchronous>, transform_indices = @transform_9, window_bounds = array<i64: 8, 1>}, {pipeline_mode = #tpu.pipeline_mode<synchronous>, transform_indices = @transform_10, window_bounds = array<i64: 8, 1>}, {pipeline_mode = #tpu.pipeline_mode<synchronous>, transform_indices = @transform_11, window_bounds = array<i64: 8, 8>}, {pipeline_mode = #tpu.pipeline_mode<synchronous>, transform_indices = @transform_12, window_bounds = array<i64: 8, 1>}, {pipeline_mode = #tpu.pipeline_mode<synchronous>, transform_indices = @transform_13, window_bounds = array<i64: 2, 256>}, {transform_indices = @transform_14, window_bounds = array<i64: 1, 8, 256>}]} {
    %cst = arith.constant 0.000000e+00 : f32
    %0 = vector.broadcast %cst : f32 to vector<4x290xf32>
    %c0 = arith.constant 0 : index
    %c0_0 = arith.constant 0 : index
    %1 = vector.load %arg16[%c0, %c0_0] : memref<4x290xf32, #tpu.memory_space<vmem>>, vector<4x290xf32>
    tpu.vector_store %arg16[%c0, %c0_0], %0 {strides = array<i32>} : memref<4x290xf32, #tpu.memory_space<vmem>>, vector<4x290xf32>,
    %c0_1 = arith.constant 0 : index
    %c0_2 = arith.constant 0 : index
    %2 = vector.load %arg14[%c0_1, %c0_2] : memref<2x256xf32, #tpu.memory_space<vmem>>, vector<1x256xf32>
    %c1 = arith.constant 1 : index
    %c0_3 = arith.constant 0 : index
    %3 = vector.load %arg14[%c1, %c0_3] : memref<2x256xf32, #tpu.memory_space<vmem>>, vector<1x256xf32>
    %c0_4 = arith.constant 0 : index
    %c0_5 = arith.constant 0 : index
    %c0_6 = arith.constant 0 : index
    %4 = vector.load %arg1[%c0_4, %c0_5, %c0_6] : memref<1x4x256xf32, #tpu.memory_space<vmem>>, vector<1x4x256xf32>
    %5 = vector.shape_cast %4 : vector<1x4x256xf32> to vector<4x256xf32>
    %c0_7 = arith.constant 0 : index
    %c0_8 = arith.constant 0 : index
    %6 = vector.load %arg2[%c0_7, %c0_8] : memref<4x4xf32, #tpu.memory_space<vmem>>, vector<4x4xf32>
    %cst_9 = arith.constant dense<0.000000e+00> : vector<4x256xf32>
    %7 = tpu.matmul %6, %5, %cst_9 {dimension_numbers = #tpu.dot_dimension_numbers<[1], [0], [0], [1], [0, 0, 1, 1], [], []>} : vector<4x4xf32>, vector<4x256xf32>, vector<4x256xf32> -> vector<4x256xf32>
    %c0_10 = arith.constant 0 : index
    %c0_11 = arith.constant 0 : index
    %8 = vector.load %arg3[%c0_10, %c0_11] : memref<4x1xf32, #tpu.memory_space<vmem>>, vector<4x1xf32>
    %9 = vector.broadcast %8 : vector<4x1xf32> to vector<4x256xf32>
    %10 = arith.addf %7, %9 : vector<4x256xf32>
    %11 = math.exp %10 : vector<4x256xf32>
    %cst_12 = arith.constant 1.000000e+00 : f32
    %12 = vector.broadcast %cst_12 : f32 to vector<4x256xf32>
    %13 = arith.addf %12, %11 : vector<4x256xf32>
    %14 = math.log %13 : vector<4x256xf32>
    %15 = math.tanh %14 : vector<4x256xf32>
    %16 = arith.mulf %10, %15 : vector<4x256xf32>
    %c0_13 = arith.constant 0 : index
    %c0_14 = arith.constant 0 : index
    %c0_15 = arith.constant 0 : index
    %17 = vector.load %arg4[%c0_13, %c0_14, %c0_15] : memref<1x4x4xf32, #tpu.memory_space<vmem>>, vector<1x4x4xf32>
    %18 = vector.shape_cast %17 : vector<1x4x4xf32> to vector<4x4xf32>
    %cst_16 = arith.constant dense<0.000000e+00> : vector<4x256xf32>
    %19 = tpu.matmul %18, %16, %cst_16 {dimension_numbers = #tpu.dot_dimension_numbers<[1], [0], [0], [1], [0, 0, 1, 1], [], []>} : vector<4x4xf32>, vector<4x256xf32>, vector<4x256xf32> -> vector<4x256xf32>
    %c0_17 = arith.constant 0 : index
    %c0_18 = arith.constant 0 : index
    %c0_19 = arith.constant 0 : index
    %20 = vector.load %arg5[%c0_17, %c0_18, %c0_19] : memref<1x4x1xf32, #tpu.memory_space<vmem>>, vector<1x4x1xf32>
    %21 = vector.shape_cast %20 : vector<1x4x1xf32> to vector<4x1xf32>
    %22 = vector.broadcast %21 : vector<4x1xf32> to vector<4x256xf32>
    %23 = arith.addf %19, %22 : vector<4x256xf32>
    %24 = math.exp %23 : vector<4x256xf32>
    %cst_20 = arith.constant 1.000000e+00 : f32
    %25 = vector.broadcast %cst_20 : f32 to vector<4x256xf32>
    %26 = arith.addf %25, %24 : vector<4x256xf32>
    %27 = math.log %26 : vector<4x256xf32>
    %28 = math.tanh %27 : vector<4x256xf32>
    %29 = arith.mulf %23, %28 : vector<4x256xf32>
    %c0_21 = arith.constant 0 : index
    %c17 = arith.constant 17 : index
    %30 = vector.load %arg16[%c0_21, %c17] : memref<4x290xf32, #tpu.memory_space<vmem>>, vector<4x256xf32>
    tpu.vector_store %arg16[%c0_21, %c17], %29 {strides = array<i32>} : memref<4x290xf32, #tpu.memory_space<vmem>>, vector<4x256xf32>,
    %c0_22 = arith.constant 0 : index
    %c0_23 = arith.constant 0 : index
    %31 = vector.load %arg16[%c0_22, %c0_23] : memref<4x290xf32, #tpu.memory_space<vmem>>, vector<4x256xf32>
    %32 = vector.broadcast %2 : vector<1x256xf32> to vector<4x256xf32>
    %33 = arith.mulf %31, %32 : vector<4x256xf32>
    %c0_24 = arith.constant 0 : index
    %c1_25 = arith.constant 1 : index
    %34 = vector.load %arg16[%c0_24, %c1_25] : memref<4x290xf32, #tpu.memory_space<vmem>>, vector<4x256xf32>
    %c0_26 = arith.constant 0 : index
    %c2 = arith.constant 2 : index
    %35 = vector.load %arg16[%c0_26, %c2] : memref<4x290xf32, #tpu.memory_space<vmem>>, vector<4x256xf32>
    %36 = vector.broadcast %3 : vector<1x256xf32> to vector<4x256xf32>
    %37 = arith.mulf %35, %36 : vector<4x256xf32>
    %c0_27 = arith.constant 0 : index
    %c16 = arith.constant 16 : index
    %38 = vector.load %arg16[%c0_27, %c16] : memref<4x290xf32, #tpu.memory_space<vmem>>, vector<4x256xf32>
    %39 = vector.broadcast %2 : vector<1x256xf32> to vector<4x256xf32>
    %40 = arith.mulf %38, %39 : vector<4x256xf32>
    %c0_28 = arith.constant 0 : index
    %c17_29 = arith.constant 17 : index
    %41 = vector.load %arg16[%c0_28, %c17_29] : memref<4x290xf32, #tpu.memory_space<vmem>>, vector<4x256xf32>
    %c0_30 = arith.constant 0 : index
    %c18 = arith.constant 18 : index
    %42 = vector.load %arg16[%c0_30, %c18] : memref<4x290xf32, #tpu.memory_space<vmem>>, vector<4x256xf32>
    %43 = vector.broadcast %3 : vector<1x256xf32> to vector<4x256xf32>
    %44 = arith.mulf %42, %43 : vector<4x256xf32>
    %c0_31 = arith.constant 0 : index
    %c32 = arith.constant 32 : index
    %45 = vector.load %arg16[%c0_31, %c32] : memref<4x290xf32, #tpu.memory_space<vmem>>, vector<4x256xf32>
    %46 = vector.broadcast %2 : vector<1x256xf32> to vector<4x256xf32>
    %47 = arith.mulf %45, %46 : vector<4x256xf32>
    %c0_32 = arith.constant 0 : index
    %c33 = arith.constant 33 : index
    %48 = vector.load %arg16[%c0_32, %c33] : memref<4x290xf32, #tpu.memory_space<vmem>>, vector<4x256xf32>
    %c0_33 = arith.constant 0 : index
    %c34 = arith.constant 34 : index
    %49 = vector.load %arg16[%c0_33, %c34] : memref<4x290xf32, #tpu.memory_space<vmem>>, vector<4x256xf32>
    %50 = vector.broadcast %3 : vector<1x256xf32> to vector<4x256xf32>
    %51 = arith.mulf %49, %50 : vector<4x256xf32>
    %52 = tpu.concatenate %33, %34, %37, %40, %41, %44, %47, %48, %51 in 0 : vector<4x256xf32>, vector<4x256xf32>, vector<4x256xf32>, vector<4x256xf32>, vector<4x256xf32>, vector<4x256xf32>, vector<4x256xf32>, vector<4x256xf32>, vector<4x256xf32> -> vector<36x256xf32>
    %c0_34 = arith.constant 0 : index
    %c0_35 = arith.constant 0 : index
    %c0_36 = arith.constant 0 : index
    %53 = vector.load %arg6[%c0_34, %c0_35, %c0_36] : memref<1x4x36xf32, #tpu.memory_space<vmem>>, vector<1x4x36xf32>
    %54 = vector.shape_cast %53 : vector<1x4x36xf32> to vector<4x36xf32>
    %cst_37 = arith.constant dense<0.000000e+00> : vector<4x256xf32>
    %55 = tpu.matmul %54, %52, %cst_37 {dimension_numbers = #tpu.dot_dimension_numbers<[1], [0], [0], [1], [0, 0, 1, 1], [], []>} : vector<4x36xf32>, vector<36x256xf32>, vector<4x256xf32> -> vector<4x256xf32>
    %c0_38 = arith.constant 0 : index
    %c0_39 = arith.constant 0 : index
    %c0_40 = arith.constant 0 : index
    %56 = vector.load %arg7[%c0_38, %c0_39, %c0_40] : memref<1x4x1xf32, #tpu.memory_space<vmem>>, vector<1x4x1xf32>
    %57 = vector.shape_cast %56 : vector<1x4x1xf32> to vector<4x1xf32>
    %58 = vector.broadcast %57 : vector<4x1xf32> to vector<4x256xf32>
    %59 = arith.addf %55, %58 : vector<4x256xf32>
    %60 = math.exp %59 : vector<4x256xf32>
    %cst_41 = arith.constant 1.000000e+00 : f32
    %61 = vector.broadcast %cst_41 : f32 to vector<4x256xf32>
    %62 = arith.addf %61, %60 : vector<4x256xf32>
    %63 = math.log %62 : vector<4x256xf32>
    %64 = math.tanh %63 : vector<4x256xf32>
    %65 = arith.mulf %59, %64 : vector<4x256xf32>
    %66 = arith.addf %16, %65 : vector<4x256xf32>
    %c0_42 = arith.constant 0 : index
    %c0_43 = arith.constant 0 : index
    %67 = vector.load %arg8[%c0_42, %c0_43] : memref<4x4xf32, #tpu.memory_space<vmem>>, vector<4x4xf32>
    %cst_44 = arith.constant dense<0.000000e+00> : vector<4x256xf32>
    %68 = tpu.matmul %67, %66, %cst_44 {dimension_numbers = #tpu.dot_dimension_numbers<[1], [0], [0], [1], [0, 0, 1, 1], [], []>} : vector<4x4xf32>, vector<4x256xf32>, vector<4x256xf32> -> vector<4x256xf32>
    %c0_45 = arith.constant 0 : index
    %c0_46 = arith.constant 0 : index
    %69 = vector.load %arg9[%c0_45, %c0_46] : memref<4x4xf32, #tpu.memory_space<vmem>>, vector<4x4xf32>
    %cst_47 = arith.constant dense<0.000000e+00> : vector<4x256xf32>
    %70 = tpu.matmul %69, %5, %cst_47 {dimension_numbers = #tpu.dot_dimension_numbers<[1], [0], [0], [1], [0, 0, 1, 1], [], []>} : vector<4x4xf32>, vector<4x256xf32>, vector<4x256xf32> -> vector<4x256xf32>
    %71 = tpu.concatenate %68, %70 in 0 : vector<4x256xf32>, vector<4x256xf32> -> vector<8x256xf32>
    %c0_48 = arith.constant 0 : index
    %c0_49 = arith.constant 0 : index
    %72 = vector.load %arg10[%c0_48, %c0_49] : memref<8x1xf32, #tpu.memory_space<vmem>>, vector<8x1xf32>
    %73 = vector.broadcast %72 : vector<8x1xf32> to vector<8x256xf32>
    %74 = arith.mulf %71, %73 : vector<8x256xf32>
    %c0_50 = arith.constant 0 : index
    %c0_51 = arith.constant 0 : index
    %75 = vector.load %arg11[%c0_50, %c0_51] : memref<8x1xf32, #tpu.memory_space<vmem>>, vector<8x1xf32>
    %76 = vector.broadcast %75 : vector<8x1xf32> to vector<8x256xf32>
    %77 = arith.addf %74, %76 : vector<8x256xf32>
    %78 = math.exp %77 : vector<8x256xf32>
    %cst_52 = arith.constant 1.000000e+00 : f32
    %79 = vector.broadcast %cst_52 : f32 to vector<8x256xf32>
    %80 = arith.addf %79, %78 : vector<8x256xf32>
    %81 = math.log %80 : vector<8x256xf32>
    %82 = math.tanh %81 : vector<8x256xf32>
    %83 = arith.mulf %77, %82 : vector<8x256xf32>
    %c0_53 = arith.constant 0 : index
    %c0_54 = arith.constant 0 : index
    %84 = vector.load %arg12[%c0_53, %c0_54] : memref<8x8xf32, #tpu.memory_space<vmem>>, vector<8x8xf32>
    %cst_55 = arith.constant dense<0.000000e+00> : vector<8x256xf32>
    %85 = tpu.matmul %84, %83, %cst_55 {dimension_numbers = #tpu.dot_dimension_numbers<[1], [0], [0], [1], [0, 0, 1, 1], [], []>} : vector<8x8xf32>, vector<8x256xf32>, vector<8x256xf32> -> vector<8x256xf32>
    %c0_56 = arith.constant 0 : index
    %c0_57 = arith.constant 0 : index
    %86 = vector.load %arg13[%c0_56, %c0_57] : memref<8x1xf32, #tpu.memory_space<vmem>>, vector<8x1xf32>
    %87 = vector.broadcast %86 : vector<8x1xf32> to vector<8x256xf32>
    %88 = arith.addf %85, %87 : vector<8x256xf32>
    %89 = math.exp %88 : vector<8x256xf32>
    %cst_58 = arith.constant 1.000000e+00 : f32
    %90 = vector.broadcast %cst_58 : f32 to vector<8x256xf32>
    %91 = arith.addf %90, %89 : vector<8x256xf32>
    %92 = math.log %91 : vector<8x256xf32>
    %93 = math.tanh %92 : vector<8x256xf32>
    %94 = arith.mulf %88, %93 : vector<8x256xf32>
    %c0_59 = arith.constant 0 : index
    %c0_60 = arith.constant 0 : index
    %c0_61 = arith.constant 0 : index
    %95 = vector.load %arg15[%c0_59, %c0_60, %c0_61] : memref<1x8x256xf32, #tpu.memory_space<vmem>>, vector<1x8x256xf32>
    %96 = vector.shape_cast %95 : vector<1x8x256xf32> to vector<8x256xf32>
    %97 = vector.shape_cast %94 : vector<8x256xf32> to vector<1x8x256xf32>
    tpu.vector_store %arg15[%c0_59, %c0_60, %c0_61], %97 {strides = array<i32>} : memref<1x8x256xf32, #tpu.memory_space<vmem>>, vector<1x8x256xf32>,
    return
  }
  func.func @transform_0(%arg0: i32) -> (i32, i32, i32) {
    %c0_i32 = arith.constant 0 : i32
    %c0_i32_0 = arith.constant 0 : i32
    %c0_i32_1 = arith.constant 0 : i32
    return %arg0, %c0_i32, %c0_i32_0 : i32, i32, i32
  }
  func.func @transform_1(%arg0: i32) -> (i32, i32) {
    %c0_i32 = arith.constant 0 : i32
    %c0_i32_0 = arith.constant 0 : i32
    %c0_i32_1 = arith.constant 0 : i32
    return %c0_i32, %c0_i32_0 : i32, i32
  }
  func.func @transform_2(%arg0: i32) -> (i32, i32) {
    %c0_i32 = arith.constant 0 : i32
    %c0_i32_0 = arith.constant 0 : i32
    %c0_i32_1 = arith.constant 0 : i32
    return %c0_i32, %c0_i32_0 : i32, i32
  }
  func.func @transform_3(%arg0: i32) -> (i32, i32, i32) {
    %c0_i32 = arith.constant 0 : i32
    %c0_i32_0 = arith.constant 0 : i32
    %c0_i32_1 = arith.constant 0 : i32
    %c0_i32_2 = arith.constant 0 : i32
    return %c0_i32, %c0_i32_0, %c0_i32_1 : i32, i32, i32
  }
  func.func @transform_4(%arg0: i32) -> (i32, i32, i32) {
    %c0_i32 = arith.constant 0 : i32
    %c0_i32_0 = arith.constant 0 : i32
    %c0_i32_1 = arith.constant 0 : i32
    %c0_i32_2 = arith.constant 0 : i32
    return %c0_i32, %c0_i32_0, %c0_i32_1 : i32, i32, i32
  }
  func.func @transform_5(%arg0: i32) -> (i32, i32, i32) {
    %c0_i32 = arith.constant 0 : i32
    %c0_i32_0 = arith.constant 0 : i32
    %c0_i32_1 = arith.constant 0 : i32
    %c0_i32_2 = arith.constant 0 : i32
    return %c0_i32, %c0_i32_0, %c0_i32_1 : i32, i32, i32
  }
  func.func @transform_6(%arg0: i32) -> (i32, i32, i32) {
    %c0_i32 = arith.constant 0 : i32
    %c0_i32_0 = arith.constant 0 : i32
    %c0_i32_1 = arith.constant 0 : i32
    %c0_i32_2 = arith.constant 0 : i32
    return %c0_i32, %c0_i32_0, %c0_i32_1 : i32, i32, i32
  }
  func.func @transform_7(%arg0: i32) -> (i32, i32) {
    %c0_i32 = arith.constant 0 : i32
    %c0_i32_0 = arith.constant 0 : i32
    %c0_i32_1 = arith.constant 0 : i32
    return %c0_i32, %c0_i32_0 : i32, i32
  }
  func.func @transform_8(%arg0: i32) -> (i32, i32) {
    %c0_i32 = arith.constant 0 : i32
    %c0_i32_0 = arith.constant 0 : i32
    %c0_i32_1 = arith.constant 0 : i32
    return %c0_i32, %c0_i32_0 : i32, i32
  }
  func.func @transform_9(%arg0: i32) -> (i32, i32) {
    %c0_i32 = arith.constant 0 : i32
    %c0_i32_0 = arith.constant 0 : i32
    %c0_i32_1 = arith.constant 0 : i32
    return %c0_i32, %c0_i32_0 : i32, i32
  }
  func.func @transform_10(%arg0: i32) -> (i32, i32) {
    %c0_i32 = arith.constant 0 : i32
    %c0_i32_0 = arith.constant 0 : i32
    %c0_i32_1 = arith.constant 0 : i32
    return %c0_i32, %c0_i32_0 : i32, i32
  }
  func.func @transform_11(%arg0: i32) -> (i32, i32) {
    %c0_i32 = arith.constant 0 : i32
    %c0_i32_0 = arith.constant 0 : i32
    %c0_i32_1 = arith.constant 0 : i32
    return %c0_i32, %c0_i32_0 : i32, i32
  }
  func.func @transform_12(%arg0: i32) -> (i32, i32) {
    %c0_i32 = arith.constant 0 : i32
    %c0_i32_0 = arith.constant 0 : i32
    %c0_i32_1 = arith.constant 0 : i32
    return %c0_i32, %c0_i32_0 : i32, i32
  }
  func.func @transform_13(%arg0: i32) -> (i32, i32) {
    %c0_i32 = arith.constant 0 : i32
    %c0_i32_0 = arith.constant 0 : i32
    %c0_i32_1 = arith.constant 0 : i32
    return %c0_i32, %c0_i32_0 : i32, i32
  }
  func.func @transform_14(%arg0: i32) -> (i32, i32, i32) {
    %c0_i32 = arith.constant 0 : i32
    %c0_i32_0 = arith.constant 0 : i32
    %c0_i32_1 = arith.constant 0 : i32
    return %arg0, %c0_i32, %c0_i32_0 : i32, i32, i32
  }
}

</mosaic_0001>

<bundles_post_ra>
// kernel: tpu_custom_call.1
= control target key start
LH: loop header
LB: loop body
LE: loop exit
PB: predicated region body
PF: predicated region fallthrough
CT: control target
= control target key end

     0   :  { %s1871_s0 = inlined_call_operand.vmem [shape: f32[2,4,256], index: 0, kind: input, shape index: {}]   ;;  %s1872_s1 = inlined_call_operand.vmem [shape: f32[4,4], index: 1, kind: input, shape index: {}]   ;;  %s1873_s2 = inlined_call_operand.vmem [shape: f32[4,1], index: 2, kind: input, shape index: {}]   ;;  %s1874_s3 = inlined_call_operand.vmem [shape: f32[1,4,4], index: 3, kind: input, shape index: {}]   ;;  %s1875_s4 = inlined_call_operand.vmem [shape: f32[1,4,1], index: 4, kind: input, shape index: {}]   ;;  %s1876_s5 = inlined_call_operand.vmem [shape: f32[1,4,36], index: 5, kind: input, shape index: {}]   ;;  %s1877_s6 = inlined_call_operand.vmem [shape: f32[1,4,1], index: 6, kind: input, shape index: {}]   ;;  %s1878_s7 = inlined_call_operand.vmem [shape: f32[4,4], index: 7, kind: input, shape index: {}]   ;;  %s1879_s8 = inlined_call_operand.vmem [shape: f32[4,4], index: 8, kind: input, shape index: {}]   ;;  %s1880_s9 = inlined_call_operand.vmem [shape: f32[8,1], index: 9, kind: input, shape index: {}]   ;;  %s1881_s10 = inlined_call_operand.vmem [shape: f32[8,1], index: 10, kind: input, shape index: {}]   ;;  %s1882_s11 = inlined_call_operand.vmem [shape: f32[8,8], index: 11, kind: input, shape index: {}]   ;;  %s1883_s12 = inlined_call_operand.vmem [shape: f32[8,1], index: 12, kind: input, shape index: {}]   ;;  %s1884_s13 = inlined_call_operand.vmem [shape: f32[2,256], index: 13, kind: input, shape index: {}]   ;;  %s1885_s14 = inlined_call_operand.hbm [shape: f32[2,8,256], index: 14, kind: output, shape index: {}]  }
   0x1   :  { %1887 = sst [smem:[#allocation8_spill]] %s1871_s0 }
   0x2   :  { %1888 = sst [smem:[#allocation9_spill]] %s1872_s1 }
   0x3   :  { %1889 = sst [smem:[#allocation10_spill]] %s1873_s2 }
   0x4   :  { %19 = vsyncpa [#allocation4], 0 }
   0x5   :  { %21 = vsyncpa [#allocation4 + $0x1], 0  ;;  %s1655_s29 = smov 0   ;;  %s1657_s30 = smov 0  }
   0x6   :  { %s1659_s15 = smov 0   ;;  %s1661_s16 = smov 0  }
   0x7 LB: > { %1890 = sst [smem:[#allocation6_spill]] %s1557_s15  ;;  %s1676_s17 = sadd.s32 4294967295, %s1561_s16   ;;  %s1561_s16 = sphi %s1661_s16, %s1901_s16   ;;  %s1557_s15 = sphi %s1659_s15, %s1898_s15   ;;  %s1553_s30 = sphi %s1657_s30, %s1900_s30   ;;  %s1549_s29 = sphi %s1655_s29, %s1899_s29  }
   0x8   : > { %s1349_s18 = sadd.s32 4294967294, %s1561_s16   ;;  %s1680_s19 = sadd.s32 1, %s1561_s16  }
   0x9   : > { %s333_s20 = sadd.s32 1, %s1557_s15  ;;  %s330_s21 = ssub.s32 %s1561_s16, %s1680_s19 }
   0xa   : > { %p343_p0 = scmp.ne.s32.totalorder %s1557_s15, %s1553_s30  ;;  %p331_p1 = scmp.eq.s32.totalorder %s330_s21, 0 }
   0xb   : > { %p344_p2 = scmp.eq.s32.totalorder %s1676_s17, 1  ;;  %p349_p3 = scmp.ne.s32.totalorder %s1553_s30, %s1549_s29 }
   0xc   : > { %p350_p4 = scmp.eq.s32.totalorder %s1349_s18, 1  ;;  %p1352_p7 = scmp.ge.s32.totalorder %s1561_s16, 1 }
   0xd   : > { %s1691_s22 = scalar_select %p331_p1, %s1557_s15, %s333_s20  }
   0xe   : > { %p1693_p5 = por %p344_p2, %p343_p0  ;;  %p1697_p6 = por %p350_p4, %p349_p3 }
   0xf   : > { %1891 = sst [smem:[#allocation7_spill]] %s1691_s22  ;;  %p415_p8 = scmp.lt.s32.totalorder %s1561_s16, 3 }
  0x11   : > { %p416_p9 = pnand %p1352_p7, %p415_p8 }
  0x12   : > { %p461_p10 = scmp.lt.s32.totalorder (!%p416_p9), %s1676_s17, 1  ;;  %s1894_s2 = sld [smem:[#allocation10_spill]] (!%p416_p9) }
  0x13   : > { %419 = sbr.rel (%p416_p9) target bundleno = 1588 (0x634), region = 76  ;;  %s1895_s0 = sld [smem:[#allocation8_spill]] (!%p416_p9) }
  0x14   : > { %s1896_s1 = sld [smem:[#allocation9_spill]] (!%p416_p9)  ;;  %s1565_s21 = smov (!%p416_p9), 32  }
  0x15   : > { %s1566_s25 = smov (!%p416_p9), 2   ;;  %s1567_s26 = smov (!%p416_p9), 17  }
  0x16   : > { %s1569_s22 = smov (!%p416_p9), 18   ;;  %s1572_s18 = smov (!%p416_p9), 95  }
  0x17   : > { %s1573_s20 = smov (!%p416_p9), 127  }
  0x18   : > { %v1563_v0 = vmov 0.0   ;;  %v474_v1 = vld [vmem:[%s1894_s2] sm:$0xf]  ;;  %s462_s27 = scalar_select %p461_p10, %s1676_s17, 1  ;;  %v1564_v2 = vmov 0   ;;  %vm486_vm0 = vcmask 1043456   ;;  %v695_v27 = vlaneseq }
  0x19   : > { %555 = vmatprep.mubr.f32.mxu0 %v1563_v0  ;;  %466 = vst [vmem:[#allocation2] sm:$0xff] %v1563_v0  ;;  %656 = vmatprep.mubr.f32.mxu1 %v1563_v0  ;;  %v577_v3 = vld [vmem:[%s1875_s4] sm:$0xf]  ;;  %vm482_vm1 = vcmask 31744   ;;  %vm467_vm2 = vcmask 273408   ;;  %vm687_vm3 = vcmask 1043592  }
  0x1a   : > { %1435 = vset.pattern.permute.xlu0 %v1564_v2  ;;  %1436 = vset.pattern.permute.xlu1 %v1564_v2  ;;  %s1378_s28 = sshll.u32 %s462_s27, 3  ;;  %v473_v6 = vld [vmem:[%s1896_s1] sm:$0xf]  ;;  %v696_v28 = vshrl.u32 %v695_v27, 7  ;;  %468 = vst.msk [vmem:[#allocation2 + $0x8] sm:$0xf] %vm467_vm2, %v1563_v0 }
  0x1b   : > { %477 = vperm.xlu0 %1435, %v474_v1   ;;  %s465_s15 = scalar_lea.vmem %s1895_s0, %s1378_s28  ;;  %v576_v26 = vld [vmem:[%s1874_s3] sm:$0xf]  ;;  %s1570_s27 = smov 16   ;;  %vm688_vm4 = vcmask 1047556   ;;  %vm683_vm5 = vcmask 138240   ;;  %vm691_vm6 = vcmask 134144  }
  0x1c   : > { %v1717_v4 = vld [vmem:[%s465_s15] sm:$0xff]  ;;  %v697_v29 = vsub.s32 0, %v696_v28  ;;  %v701_v30 = vsub.s32 1, %v696_v28  ;;  %s1568_s15 = smov 34   ;;  %vm689_vm7 = vmor %vm688_vm4, %vm687_vm3  ;;  %s1571_s28 = smov 111   ;;  %vm756_vm8 = vcmask 277504  }
  0x1d   : > { %v1721_v5 = vcombine.high %v1717_v4, %v1717_v4  ;;  %v469_v31 = vld [vmem:[%s1884_s13] ss:$2 sm:$0x3]  ;;  %v1356_v32 = vld [vmem:[%s1884_s13 + $0x1] ss:$2 sm:$0x3] }
  0x1e   : > { %v698_v33 = vrot.slane %v469_v31, %v697_v29  ;;  %v702_v34 = vrot.slane %v469_v31, %v701_v30  ;;  %v711_v36 = vrot.slane %v1356_v32, %v697_v29  ;;  %v715_v37 = vrot.slane %v1356_v32, %v701_v30  ;;  %s1579_s1 = smov [#allocation3]  }
  0x1f   : > { %580 = vperm.xlu0 %1435, %v577_v3   ;;  %1357 = vmatprep.subr.msk.mxu0 %vm486_vm0, %v1721_v5  ;;  %vm747_vm9 = vcmask 261120   ;;  %vm738_vm10 = vcmask 146432   ;;  %vm729_vm11 = vcmask 130048   ;;  %vm720_vm12 = vcmask 15360  }
  0x20   : > { %1358 = vmatpush1.msk.msra.mxu0 %vm486_vm0, %v1717_v4  ;;  %v1751_v35 = vcombine.low %v698_v33, %v702_v34  ;;  %v716_v38 = vcombine.low %v711_v36, %v715_v37  ;;  %vm870_vm13 = vcmask 769024   ;;  %vm856_vm14 = vcmask 777216  }
  0x21   : > { %1359 = vmatmul.mubr.msk.f32.vlgmr.msra.gmra.mxu0 %vm482_vm1, %v473_v6  ;;  %vm831_vm15 = vcmask 900096   ;;  %vm845_vm2 = vcmask 785408   ;;  %vm816_vm3 = vcmask 908288   ;;  %vm804_vm4 = vcmask 916480  }
  0x22   : > { %960 = vmatprep.mubr.f32.mxu0 %v1563_v0 }
  0x23   : > { %744 = vrot.lane.b32.xlu0 %v1751_v35, %s1565_s21  ;;  %s1574_s21 = smov 126  }
  0x27   : > { %717 = vrot.lane.b32.xlu0 %v716_v38, %s1566_s25  ;;  %s1575_s25 = smov 94  }
  0x96   : > { %v478_v7 = vpop.permute.xlu0 %477 }
  0x9a   : > { %v581_v39 = vpop.permute.xlu0 %580 }
  0x9e   : > { %v745_v62 = vpop.permute.xlu0 %744 }
  0xa2   : > { %v718_v2 = vpop.permute.xlu0 %717 }
  0xa3   : > { %v719_v6 = vrot.slane %v718_v2, 4 }
  0xa5   : > { %v721_v36 = vsel %vm720_vm12, %v719_v6, %v718_v2 }
  0xe1   : > { %v557_v8 = vpop.f32.mrf.mxu0 }
  0xe2   : > { %v558_v9 = vadd.f32 %v557_v8, %v478_v7 }
  0xe3   : > { %v559_v10 = vpop.f32.mrf.mxu0 }
  0xe4   : > { %v562_v11 = vmul.f32 1.442695, %v558_v9  ;;  %v560_v12 = vadd.f32 %v559_v10, %v478_v7  ;;  %v746_v10 = vrot.slane %v745_v62, 4 }
  0xe6   : > { %1441 = vpow2.f32 %v562_v11  ;;  %v564_v13 = vmul.f32 1.442695, %v560_v12 }
  0xe8   : > { %1443 = vpow2.f32 %v564_v13 }
  0xf3   : > { %v1442_v14 = vpop.eup %1441 }
  0xf4   : > { %v566_v15 = vadd.f32 1.0, %v1442_v14 }
  0xf5   : > { %v1444_v16 = vpop.eup %1443 }
  0xf6   : > { %1445 = vlog2.f32 %v566_v15  ;;  %v567_v17 = vadd.f32 1.0, %v1444_v16 }
  0xf8   : > { %1447 = vlog2.f32 %v567_v17 }
 0x103   : > { %v1446_v18 = vpop.eup %1445 }
 0x104   : > { %v569_v19 = vmul.f32 0.6931472, %v1446_v18 }
 0x105   : > { %v1448_v20 = vpop.eup %1447 }
 0x106   : > { %v571_v21 = vmul.f32 0.6931472, %v1448_v20  ;;  %1449 = vtanh.f32 %v569_v19 }
 0x108   : > { %1451 = vtanh.f32 %v571_v21  ;;  %v748_v21 = vsel %vm747_vm9, %v746_v10, %v745_v62 }
 0x113   : > { %v1450_v22 = vpop.eup %1449 }
 0x114   : > { %v1734_v25 = vmul.f32 %v1450_v22, %v558_v9 }
 0x115   : > { %v1452_v23 = vpop.eup %1451 }
 0x116   : > { %v1732_v24 = vmul.f32 %v1452_v23, %v560_v12 }
 0x118   : > { %1360 = vmatprep.subr.msk.mxu1 %vm486_vm0, %v1732_v24 }
 0x119   : > { %1361 = vmatpush1.msk.msra.mxu1 %vm486_vm0, %v1734_v25 }
 0x11a   : > { %1362 = vmatmul.mubr.msk.f32.vlgmr.msra.gmra.mxu1 %vm482_vm1, %v576_v26 }
 0x11b   : > { %1057 = vmatprep.mubr.f32.mxu1 %v1563_v0 }
 0x1da   : > { %v658_v40 = vpop.f32.mrf.mxu1 }
 0x1db   : > { %v659_v41 = vadd.f32 %v658_v40, %v581_v39 }
 0x1dc   : > { %v660_v42 = vpop.f32.mrf.mxu1 }
 0x1dd   : > { %v663_v43 = vmul.f32 1.442695, %v659_v41  ;;  %v661_v44 = vadd.f32 %v660_v42, %v581_v39  ;;  %v1155_v42 = vld [vmem:[%s1881_s10] sm:$0xff] }
 0x1df   : > { %1453 = vpow2.f32 %v663_v43  ;;  %v665_v45 = vmul.f32 1.442695, %v661_v44 }
 0x1e1   : > { %1455 = vpow2.f32 %v665_v45 }
 0x1ec   : > { %v1454_v46 = vpop.eup %1453 }
 0x1ed   : > { %v667_v47 = vadd.f32 1.0, %v1454_v46 }
 0x1ee   : > { %v1456_v48 = vpop.eup %1455 }
 0x1ef   : > { %1457 = vlog2.f32 %v667_v47  ;;  %v668_v49 = vadd.f32 1.0, %v1456_v48 }
 0x1f1   : > { %1459 = vlog2.f32 %v668_v49 }
 0x1fc   : > { %v1458_v50 = vpop.eup %1457 }
 0x1fd   : > { %v670_v51 = vmul.f32 0.6931472, %v1458_v50 }
 0x1fe   : > { %v1460_v52 = vpop.eup %1459 }
 0x1ff   : > { %1461 = vtanh.f32 %v670_v51  ;;  %v672_v53 = vmul.f32 0.6931472, %v1460_v52 }
 0x201   : > { %1463 = vtanh.f32 %v672_v53 }
 0x20c   : > { %v1462_v54 = vpop.eup %1461 }
 0x20d   : > { %v675_v56 = vmul.f32 %v1462_v54, %v659_v41  ;;  %v882_v41 = vld [vmem:[%s1877_s6] sm:$0xf] }
 0x20e   : > { %v1464_v55 = vpop.eup %1463 }
 0x20f   : > { %v676_v57 = vmul.f32 %v1464_v55, %v661_v44 }
 0x211   : > { %v679_v58 = vcombine.low %v675_v56, %v676_v57 }
 0x213   : > { %680 = vrot.lane.b32.xlu1 %v679_v58, %s1567_s26  ;;  %s1576_s26 = smov 96  }
 0x217   : > { %753 = vrot.lane.b32.xlu1 %v716_v38, %s1568_s15  ;;  %s1577_s15 = smov 110  }
 0x21b   : > { %735 = vrot.lane.b32.xlu1 %v716_v38, %s1569_s22  ;;  %s1578_s22 = smov 112  }
 0x21f   : > { %726 = vrot.lane.b32.xlu1 %v1751_v35, %s1570_s27  ;;  %s1379_s27 = sshll.u32 %s1676_s17, 8  ;;  %s1505_s17 = sshll.u32 %s1579_s1, 4  ;;  %s1506_s17 = int_to_ptr.vmem [resolvable:$false] %s1505_s17 }
 0x285   : > { %v681_v59 = vpop.permute.xlu1 %680 }
 0x286   : > { %v682_v60 = vrot.slane %v681_v59, 4 }
 0x288   : > { %v684_v61 = vsel %vm683_vm5, %v682_v60, %v681_v59  ;;  %692 = vst.msk [vmem:[#allocation2 + $0x8] sm:$0xf] %vm691_vm6, %v682_v60  ;;  %vm789_vm5 = vcmask 1031168   ;;  %vm775_vm6 = vcmask 1039360  }
 0x289   : > { %690 = vst.msk [vmem:[#allocation2] sm:$0xff] %vm689_vm7, %v684_v61  ;;  %v754_v1 = vpop.permute.xlu1 %753  ;;  %vm888_vm7 = vcmask 293888  }
 0x28a   : > { %v755_v7 = vrot.slane %v754_v1, 4 }
 0x28c   : > { %v757_v11 = vsel %vm756_vm8, %v755_v7, %v754_v1 }
 0x28d   : > { %v736_v8 = vpop.permute.xlu1 %735 }
 0x28e   : > { %v737_v14 = vrot.slane %v736_v8, 4 }
 0x28f   : > { %v706_v63 = vld [vmem:[#allocation2 + $0x8] sm:$0xf] }
 0x290   : > { %v1756_v3 = vld [vmem:[#allocation2] sm:$0xff]  ;;  %814 = vrot.lane.b32.xlu0 %v706_v63, %s1571_s28  ;;  %v725_v9 = vmul.f32 %v719_v6, %v706_v63  ;;  %v761_v12 = vmul.f32 %v755_v7, %v706_v63  ;;  %v752_v15 = vmul.f32 %v746_v10, %v706_v63  ;;  %v743_v17 = vmul.f32 %v737_v14, %v706_v63 }
 0x291   : > { %810 = vrot.lane.b32.xlu1 %v1756_v3, %s1571_s28  ;;  %v760_v13 = vmul.f32 %v757_v11, %v1756_v3  ;;  %v727_v16 = vpop.permute.xlu1 %726  ;;  %v767_v19 = vcombine.low %v1756_v3, %v1756_v3  ;;  %v768_v20 = vcombine.low %v706_v63, %v706_v63  ;;  %v751_v26 = vmul.f32 %v748_v21, %v1756_v3 }
 0x292   : > { %v728_v18 = vrot.slane %v727_v16, 4  ;;  %v824_v23 = vcombine.low %v743_v17, %v743_v17  ;;  %v809_v28 = vcombine.high %v1756_v3, %v1756_v3  ;;  %v739_v29 = vsel %vm738_vm10, %v737_v14, %v736_v8 }
 0x293   : > { %v863_v30 = vcombine.high %v760_v13, %v760_v13  ;;  %v742_v31 = vmul.f32 %v739_v29, %v1756_v3  ;;  %v838_v33 = vcombine.high %v751_v26, %v751_v26  ;;  %v724_v38 = vmul.f32 %v721_v36, %v1756_v3  ;;  %v1178_v36 = vld [vmem:[%s1883_s12] sm:$0xff] }
 0x294   : > { %852 = vrot.lane.b32.xlu0 %v1756_v3, %s1572_s18  ;;  %v734_v22 = vmul.f32 %v728_v18, %v706_v63  ;;  %v730_v32 = vsel %vm729_vm11, %v728_v18, %v727_v16  ;;  %v705_v18 = vmul.f32 %v1751_v35, %v1756_v3  ;;  %v881_v35 = vld [vmem:[%s1876_s5] sm:$0xf] }
 0x295   : > { %771 = vrot.lane.b32.xlu1 %v1756_v3, %s1573_s20  ;;  %v733_v34 = vmul.f32 %v730_v32, %v1756_v3  ;;  %v823_v37 = vcombine.low %v742_v31, %v742_v31  ;;  %v782_v40 = vcombine.high %v724_v38, %v724_v38 }
 0x296   : > { %v797_v27 = vcombine.low %v734_v22, %v734_v22  ;;  %v763_v29 = vcombine.high %v705_v18, %v705_v18 }
 0x297   : > { %v796_v39 = vcombine.low %v733_v34, %v733_v34 }
 0x298   : > { %787 = vrot.lane.b32.xlu0 %v725_v9, %s1574_s21 }
 0x299   : > { %868 = vrot.lane.b32.xlu1 %v761_v12, %s1575_s25 }
 0x29c   : > { %864 = vrot.lane.b32.xlu0 %v760_v13, %s1575_s25 }
 0x29d   : > { %843 = vrot.lane.b32.xlu1 %v752_v15, %s1576_s26 }
 0x2a0   : > { %850 = vrot.lane.b32.xlu0 %v767_v19, %s1572_s18 }
 0x2a1   : > { %854 = vrot.lane.b32.xlu1 %v768_v20, %s1572_s18 }
 0x2a4   : > { %829 = vrot.lane.b32.xlu0 %v824_v23, %s1577_s15 }
 0x2a5   : > { %839 = vrot.lane.b32.xlu1 %v751_v26, %s1576_s26 }
 0x2a8   : > { %802 = vrot.lane.b32.xlu0 %v797_v27, %s1578_s22 }
 0x2a9   : > { %812 = vrot.lane.b32.xlu1 %v809_v28, %s1571_s28 }
 0x2ac   : > { %866 = vrot.lane.b32.xlu0 %v863_v30, %s1575_s25 }
 0x2ad   : > { %827 = vrot.lane.b32.xlu1 %v742_v31, %s1577_s15 }
 0x2b0   : > { %841 = vrot.lane.b32.xlu0 %v838_v33, %s1576_s26 }
 0x2b1   : > { %800 = vrot.lane.b32.xlu1 %v733_v34, %s1578_s22  ;;  %v1147_v34 = vld [vmem:[%s1880_s9] sm:$0xff] }
 0x2b4   : > { %825 = vrot.lane.b32.xlu0 %v823_v37, %s1577_s15  ;;  %s458_s15 = sand.u32 1, %s1553_s30  }
 0x2b5   : > { %783 = vrot.lane.b32.xlu1 %v724_v38, %s1574_s21  ;;  %s1276_s26 = scalar_lea.sflag [#allocation4], %s458_s15 }
 0x2b8   : > { %798 = vrot.lane.b32.xlu0 %v796_v39, %s1578_s22  ;;  %s1353_s22 = sshll.u32 %s458_s15, 4 }
 0x2b9   : > { %785 = vrot.lane.b32.xlu1 %v782_v40, %s1574_s21  ;;  %s460_s28 = scalar_lea.vmem [#allocation3], %s1353_s22  ;;  %s1288_s21 = scalar_lea.hbm %s1885_s14, %s1379_s27 }
 0x2ba   : > { %s1290_s18 = sshll.u32 %s460_s28, 4  ;;  %s1507_s22 = scalar_lea.vmem %s1506_s17, 512  ;;  %s1291_s18 = int_to_ptr.vmem [resolvable:$true] %s1290_s18 }
 0x2bb   : > { %s1501_s0 = scalar_lea.vmem %s1291_s18, 256  ;;  %p1508_p0 = scmp.lt.s32.totalorder %s1291_s18, %s1506_s17 }
 0x2bc   : > { %773 = vrot.lane.b32.xlu0 %v768_v20, %s1573_s20  ;;  %p1502_p11 = scmp.ne.s32.totalorder %s1291_s18, %s1501_s0  ;;  %p1509_p1 = scmp.lt.s32.totalorder %s1507_s22, %s1501_s0 }
 0x2bd   : > { %769 = vrot.lane.b32.xlu1 %v767_v19, %s1573_s20 }
 0x2be   : > { %p1503_p12 = pnand %p1502_p11, %p1693_p5  ;;  %p1510_p2 = por %p1509_p1, %p1508_p0 }
 0x2c0   : > { %885 = vperm.xlu0 %1435, %v882_v41   ;;  %p1504_p13 = pneg %p1503_p12 }
 0x2c1   : > { %1150 = vperm.xlu1 %1436, %v1147_v34  }
 0x2c2   : > { %p1511_p3 = pnand %p1510_p2, %p1504_p13 }
 0x2c4   : > { %1158 = vperm.xlu0 %1435, %v1155_v42  }
 0x2c5   : > { %1181 = vperm.xlu1 %1436, %v1178_v36  }
 0x302   : > { %v815_v43 = vpop.permute.xlu0 %814 }
 0x303   : > { %v811_v44 = vpop.permute.xlu1 %810 }
 0x306   : > { %v853_v45 = vpop.permute.xlu0 %852 }
 0x307   : > { %v772_v46 = vpop.permute.xlu1 %771 }
 0x30a   : > { %v788_v47 = vpop.permute.xlu0 %787 }
 0x30b   : > { %v869_v48 = vpop.permute.xlu1 %868 }
 0x30e   : > { %v865_v49 = vpop.permute.xlu0 %864 }
 0x30f   : > { %v844_v50 = vpop.permute.xlu1 %843 }
 0x312   : > { %v851_v51 = vpop.permute.xlu0 %850 }
 0x313   : > { %v855_v52 = vpop.permute.xlu1 %854  ;;  %v857_v61 = vsel %vm856_vm14, %v851_v51, %v853_v45 }
 0x314   : > { %v858_v63 = vsel %vm856_vm14, %v853_v45, %v855_v52 }
 0x316   : > { %v830_v53 = vpop.permute.xlu0 %829 }
 0x317   : > { %v840_v54 = vpop.permute.xlu1 %839 }
 0x31a   : > { %v803_v55 = vpop.permute.xlu0 %802 }
 0x31b   : > { %v813_v56 = vpop.permute.xlu1 %812 }
 0x31c   : > { %v818_v10 = vsel %vm816_vm3, %v813_v56, %v815_v43  ;;  %v817_v13 = vsel %vm816_vm3, %v811_v44, %v813_v56 }
 0x31e   : > { %v867_v57 = vpop.permute.xlu0 %866 }
 0x31f   : > { %v871_v58 = vsel %vm870_vm13, %v865_v49, %v867_v57  ;;  %v872_v59 = vsel %vm870_vm13, %v867_v57, %v869_v48  ;;  %v828_v60 = vpop.permute.xlu1 %827 }
 0x320   : > { %1363 = vmatprep.subr.msk.mxu0 %vm486_vm0, %v872_v59  ;;  %v833_v1 = vsel %vm831_vm15, %v828_v60, %v830_v53 }
 0x321   : > { %1364 = vmatpush1.msk.msra.mxu0 %vm486_vm0, %v871_v58  ;;  %v878_v12 = vsel %vm486_vm0, %v818_v10, %v833_v1  ;;  %v983_v58 = vld [vmem:[%s1878_s7] sm:$0xf] }
 0x322   : > { %v842_v62 = vpop.permute.xlu0 %841 }
 0x323   : > { %v846_v2 = vsel %vm845_vm2, %v840_v54, %v842_v62  ;;  %v847_v6 = vsel %vm845_vm2, %v842_v62, %v844_v50  ;;  %v801_v7 = vpop.permute.xlu1 %800 }
 0x324   : > { %v880_v8 = vsel %vm486_vm0, %v847_v6, %v858_v63  ;;  %v879_v9 = vsel %vm486_vm0, %v846_v2, %v857_v61  ;;  %v806_v21 = vsel %vm804_vm4, %v801_v7, %v803_v55 }
 0x325   : > { %920 = vmatprep.subr.mxu0 %v880_v8 }
 0x326   : > { %v826_v11 = vpop.permute.xlu0 %825  ;;  %921 = vmatpush1.msra.mxu0 %v879_v9 }
 0x327   : > { %v832_v14 = vsel %vm831_vm15, %v826_v11, %v828_v60  ;;  %922 = vmatprep.subr.mxu0 %v878_v12  ;;  %v784_v15 = vpop.permute.xlu1 %783 }
 0x328   : > { %v877_v16 = vsel %vm486_vm0, %v817_v13, %v832_v14 }
 0x329   : > { %923 = vmatpush1.msra.mxu0 %v877_v16 }
 0x32a   : > { %v799_v17 = vpop.permute.xlu0 %798 }
 0x32b   : > { %v805_v19 = vsel %vm804_vm4, %v799_v17, %v801_v7  ;;  %v786_v20 = vpop.permute.xlu1 %785 }
 0x32c   : > { %v790_v22 = vsel %vm789_vm5, %v784_v15, %v786_v20  ;;  %v791_v23 = vsel %vm789_vm5, %v786_v20, %v788_v47 }
 0x32d   : > { %v876_v26 = vsel %vm486_vm0, %v791_v23, %v806_v21  ;;  %v875_v27 = vsel %vm486_vm0, %v790_v22, %v805_v19  ;;  %v1177_v23 = vld [vmem:[%s1882_s11] sm:$0xff] }
 0x32e   : > { %v774_v28 = vpop.permute.xlu0 %773  ;;  %924 = vmatprep.subr.mxu0 %v876_v26 }
 0x32f   : > { %v777_v30 = vsel %vm775_vm6, %v772_v46, %v774_v28  ;;  %925 = vmatpush1.msra.mxu0 %v875_v27  ;;  %v770_v31 = vpop.permute.xlu1 %769 }
 0x330   : > { %v776_v32 = vsel %vm775_vm6, %v770_v31, %v772_v46  ;;  %v874_v33 = vsel %vm486_vm0, %v763_v29, %v777_v30 }
 0x331   : > { %926 = vmatprep.subr.mxu0 %v874_v33  ;;  %v873_v3 = vsel %vm486_vm0, %v705_v18, %v776_v32 }
 0x332   : > { %927 = vmatpush1.msra.mxu0 %v873_v3 }
 0x333   : > { %1365 = vmatmul.mubr.msk.f32.vlgmr.msra.gmra.mxu0 %vm888_vm7, %v881_v35 }
 0x33b   : > { %v886_v37 = vpop.permute.xlu0 %885 }
 0x33c   : > { %v1151_v63 = vpop.permute.xlu1 %1150 }
 0x33f   : > { %v1159_v2 = vpop.permute.xlu0 %1158 }
 0x340   : > { %v1182_v26 = vpop.permute.xlu1 %1181 }
 0x3f3   : > { %v962_v38 = vpop.f32.mrf.mxu0 }
 0x3f4   : > { %v963_v39 = vadd.f32 %v962_v38, %v886_v37 }
 0x3f5   : > { %v964_v40 = vpop.f32.mrf.mxu0 }
 0x3f6   : > { %v967_v41 = vmul.f32 1.442695, %v963_v39  ;;  %v965_v42 = vadd.f32 %v964_v40, %v886_v37 }
 0x3f8   : > { %1465 = vpow2.f32 %v967_v41  ;;  %v969_v43 = vmul.f32 1.442695, %v965_v42 }
 0x3fa   : > { %1467 = vpow2.f32 %v969_v43 }
 0x405   : > { %v1466_v44 = vpop.eup %1465 }
 0x406   : > { %v971_v45 = vadd.f32 1.0, %v1466_v44 }
 0x407   : > { %v1468_v46 = vpop.eup %1467 }
 0x408   : > { %1469 = vlog2.f32 %v971_v45  ;;  %v972_v47 = vadd.f32 1.0, %v1468_v46 }
 0x40a   : > { %1471 = vlog2.f32 %v972_v47 }
 0x415   : > { %v1470_v48 = vpop.eup %1469 }
 0x416   : > { %v974_v49 = vmul.f32 0.6931472, %v1470_v48 }
 0x417   : > { %v1472_v50 = vpop.eup %1471 }
 0x418   : > { %1473 = vtanh.f32 %v974_v49  ;;  %v976_v51 = vmul.f32 0.6931472, %v1472_v50 }
 0x41a   : > { %1475 = vtanh.f32 %v976_v51 }
 0x425   : > { %v1474_v52 = vpop.eup %1473 }
 0x426   : > { %v979_v54 = vmul.f32 %v1474_v52, %v963_v39 }
 0x427   : > { %v1476_v53 = vpop.eup %1475 }
 0x428   : > { %v980_v55 = vmul.f32 %v1476_v53, %v965_v42  ;;  %v981_v57 = vadd.f32 %v979_v54, %v1734_v25 }
 0x42a   : > { %v982_v56 = vadd.f32 %v980_v55, %v1732_v24  ;;  %v1064_v24 = vld [vmem:[%s1879_s8] sm:$0xf] }
 0x42c   : > { %1366 = vmatprep.subr.msk.mxu1 %vm486_vm0, %v982_v56 }
 0x42d   : > { %1367 = vmatpush1.msk.msra.mxu1 %vm486_vm0, %v981_v57 }
 0x42e   : > { %1368 = vmatmul.mubr.msk.f32.vlgmr.msra.gmra.mxu1 %vm482_vm1, %v983_v58  ;;  %1369 = vmatprep.subr.msk.mxu1 %vm486_vm0, %v1721_v5 }
 0x42f   : > { %1370 = vmatpush1.msk.msra.mxu1 %vm486_vm0, %v1717_v4  ;;  %1132 = vmatprep.mubr.f32.mxu1 %v1563_v0 }
 0x432   : > { %1371 = vmatmul.mubr.msk.f32.vlgmr.msra.gmra.mxu1 %vm482_vm1, %v1064_v24 }
 0x433   : > { %1252 = vmatprep.mubr.f32.mxu1 %v1563_v0 }
 0x4ee   : > { %v1059_v25 = vpop.f32.mrf.mxu1 }
 0x4f0   : > { %v1061_v59 = vpop.f32.mrf.mxu1 }
 0x4f2   : > { %v1134_v60 = vpop.f32.mrf.mxu1 }
 0x4f3   : > { %v1141_v61 = vrot.slane %v1134_v60, 4 }
 0x4f4   : > { %v1136_v62 = vpop.f32.mrf.mxu1 }
 0x4f5   : > { %v1145_v5 = vsel %vm486_vm0, %v1059_v25, %v1141_v61  ;;  %v1142_v1 = vrot.slane %v1136_v62, 4 }
 0x4f6   : > { %v1153_v4 = vmul.f32 %v1151_v63, %v1145_v5 }
 0x4f7   : > { %v1146_v6 = vsel %vm486_vm0, %v1061_v59, %v1142_v1  ;;  %vm1184_vm0 = vcmask 64512  }
 0x4f8   : > { %v1161_v7 = vadd.f32 %v1159_v2, %v1153_v4  ;;  %v1154_v8 = vmul.f32 %v1151_v63, %v1146_v6 }
 0x4fa   : > { %v1163_v9 = vmul.f32 1.442695, %v1161_v7  ;;  %v1162_v10 = vadd.f32 %v1159_v2, %v1154_v8 }
 0x4fc   : > { %1477 = vpow2.f32 %v1163_v9  ;;  %v1165_v11 = vmul.f32 1.442695, %v1162_v10 }
 0x4fe   : > { %1479 = vpow2.f32 %v1165_v11 }
 0x509   : > { %v1478_v0 = vpop.eup %1477 }
 0x50a   : > { %v1167_v12 = vadd.f32 1.0, %v1478_v0 }
 0x50b   : > { %v1480_v13 = vpop.eup %1479 }
 0x50c   : > { %1481 = vlog2.f32 %v1167_v12  ;;  %v1168_v14 = vadd.f32 1.0, %v1480_v13 }
 0x50e   : > { %1483 = vlog2.f32 %v1168_v14 }
 0x519   : > { %v1482_v15 = vpop.eup %1481 }
 0x51a   : > { %v1170_v16 = vmul.f32 0.6931472, %v1482_v15 }
 0x51b   : > { %v1484_v17 = vpop.eup %1483 }
 0x51c   : > { %v1172_v18 = vmul.f32 0.6931472, %v1484_v17  ;;  %1485 = vtanh.f32 %v1170_v16 }
 0x51e   : > { %1487 = vtanh.f32 %v1172_v18 }
 0x529   : > { %v1486_v19 = vpop.eup %1485 }
 0x52a   : > { %v1175_v22 = vmul.f32 %v1486_v19, %v1161_v7 }
 0x52b   : > { %v1488_v20 = vpop.eup %1487 }
 0x52c   : > { %v1176_v21 = vmul.f32 %v1488_v20, %v1162_v10 }
 0x52e   : > { %1218 = vmatprep.subr.mxu1 %v1176_v21 }
 0x52f   : > { %1219 = vmatpush1.msra.mxu1 %v1175_v22 }
 0x530   : > { %1372 = vmatmul.mubr.msk.f32.vlgmr.msra.gmra.mxu1 %vm1184_vm0, %v1177_v23 }
 0x5f0   : > { %v1254_v27 = vpop.f32.mrf.mxu1 }
 0x5f1   : > { %v1255_v28 = vadd.f32 %v1254_v27, %v1182_v26 }
 0x5f2   : > { %v1256_v29 = vpop.f32.mrf.mxu1 }
 0x5f3   : > { %v1259_v30 = vmul.f32 1.442695, %v1255_v28  ;;  %v1257_v31 = vadd.f32 %v1256_v29, %v1182_v26 }
 0x5f5   : > { %1489 = vpow2.f32 %v1259_v30  ;;  %v1261_v32 = vmul.f32 1.442695, %v1257_v31 }
 0x5f7   : > { %1491 = vpow2.f32 %v1261_v32 }
 0x602   : > { %v1490_v33 = vpop.eup %1489 }
 0x603   : > { %v1263_v35 = vadd.f32 1.0, %v1490_v33 }
 0x604   : > { %v1492_v3 = vpop.eup %1491 }
 0x605   : > { %1493 = vlog2.f32 %v1263_v35  ;;  %v1264_v34 = vadd.f32 1.0, %v1492_v3 }
 0x607   : > { %1495 = vlog2.f32 %v1264_v34 }
 0x612   : > { %v1494_v36 = vpop.eup %1493 }
 0x613   : > { %v1266_v37 = vmul.f32 0.6931472, %v1494_v36 }
 0x614   : > { %v1496_v38 = vpop.eup %1495 }
 0x615   : > { %1497 = vtanh.f32 %v1266_v37  ;;  %v1268_v39 = vmul.f32 0.6931472, %v1496_v38 }
 0x617   : > { %1499 = vtanh.f32 %v1268_v39 }
 0x622   : > { %v1498_v40 = vpop.eup %1497 }
 0x623   : > { %v1271_v41 = vmul.f32 %v1498_v40, %v1255_v28 }
 0x624   : > { %v1500_v42 = vpop.eup %1499 }
 0x625   : > { %1273 = vst [vmem:[%s460_s28] sm:$0xff] %v1271_v41  ;;  %v1272_v43 = vmul.f32 %v1500_v42, %v1257_v31 }
 0x627   : > { %1274 = vst [vmem:[%s460_s28 + $0x8] sm:$0xff] %v1272_v43 }
 0x628   : > { %1514 = shalt.err (!%p1511_p3)
}
 0x629   : > { %s1515_s2 = scalar_lea.hbm %s1288_s21, 256  ;;  %s1519_s28 = scalar_lea.hbm %s1885_s14, 512 }
 0x62a   : > { %p1516_p4 = scmp.ne.s32.totalorder %s1288_s21, %s1515_s2  ;;  %p1520_p9 = scmp.lt.s32.totalorder %s1288_s21, %s1885_s14 }
 0x62b   : > { %p1521_p10 = scmp.lt.s32.totalorder %s1519_s28, %s1515_s2 }
 0x62c   : > { %p1517_p7 = pnand %p1516_p4, %p1693_p5 }
 0x62d   : > { %p1522_p11 = por %p1521_p10, %p1520_p9 }
 0x62e   : > { %p1518_p8 = pneg %p1517_p7 }
 0x630   : > { %p1523_p12 = pnand %p1522_p11, %p1518_p8 }
 0x632   : > { %1526 = shalt.err (!%p1523_p12)
}
 0x633   : > { %1380 = dma.vmem_to_hbm [thread:$0]  (%p1693_p5), %s1291_s18, 256, %s1288_s21, %s1276_s26  }
 0x634 PF: > { %p1386_p13 = scmp.ge.s32.totalorder %s1561_s16, 2  ;;  %s1302_s0 = sand.u32 1, %s1549_s29  }
 0x635   : > { %s1303_s1 = scalar_lea.sflag [#allocation4], %s1302_s0 }
 0x636   : > { %p1383_p0 = pnand %p1386_p13, %p1697_p6 }
 0x638   : > { %p1384_p1 = pneg %p1383_p0 }
 0x63a   : > { %1544 = dma.done.wait (%p1384_p1), %s1303_s1, 256  }
 0x63b   : > { %1546 = vsyncadd (%p1384_p1), %s1303_s1, 4294967040  ;;  %s1897_s2 = sld [smem:[#allocation6_spill]]  ;;  %p24_p2 = scmp.ge.s32.totalorder %s1680_s19, 4  }
 0x63c   : > { %s1898_s15 = sld [smem:[#allocation7_spill]]  ;;  %s1899_s29 = smov %s1553_s30 }
 0x63d   : > { %s1901_s16 = smov %s1680_s19  ;;  %26 = sbr.rel (!%p24_p2) target bundleno = 7 (0x7), region = 112 }
 0x641   : > { %s1900_s30 = smov %s1897_s2 }
 0x642   :  { %1308 = vsyncpa [#allocation4], 1 }
 0x643   :  { %1310 = vsyncpa [#allocation4 + $0x1], 1 }

</bundles_post_ra>
